<compile_context>
chip_gen: v7x
topology: tpu7x:2x2x1
jax: 0.10.0
libtpu: 0.0.40
codegen_flags: <defaults>
</compile_context>

<pallas_src>
import functools

import jax
import jax.numpy as jnp
from jax.experimental import pallas as pl
from jax.experimental.pallas import tpu as pltpu


def _mha_kernel(v_ref, w_ref, bgb_ref, o_ref, *, eps, lq):
    """One grid step == one block of Nb batch rows.

    v_ref   : (Nb, Lv*E)  values, lane-dense
    w_ref   : (Lv*E, E)   fused weight: tile_Lv(blockdiag(Wv^T) @ Wo^T)
    bgb_ref : (3, E)      row 0 = fc_out bias, row 1 = LN gamma, row 2 = LN beta
    o_ref   : (Nb, Lq*E)  lane-dense output slab
    """
    v = v_ref[...].astype(jnp.float32)                              # (Nb, Lv*E)

    # Single fused matmul: sequence colsum + per-head value proj + fc_out.
    x = jnp.dot(v, w_ref[...], preferred_element_type=jnp.float32)  # (Nb, E)
    x = x + bgb_ref[0:1, :]                                         # + bias

    # LayerNorm over E. One-pass stats: the two lane reduces are independent.
    mu = jnp.mean(x, axis=-1, keepdims=True)
    ms = jnp.mean(x * x, axis=-1, keepdims=True)
    inv = jax.lax.rsqrt(ms - mu * mu + eps)
    row = (x - mu) * inv * bgb_ref[1:2, :] + bgb_ref[2:3, :]        # (Nb, E)

    # Every query position gets the same row (softmax rows sum to 1).
    # Lane-dense store: (Nb, Lq*E) slab, unmasked vst when Lq*E % 128 == 0.
    o_ref[...] = jnp.tile(row, (1, lq)).astype(o_ref.dtype)


def _device_profile():
    """Per-generation VMEM budgets and TensorCore count (conservative default)."""
    try:
        kind = jax.devices()[0].device_kind.lower()
    except Exception:  # pragma: no cover - defensive
        kind = ""
    if ("v5" in kind) or ("v6" in kind):
        # v5e / v6e: 128 MiB VMEM, 1 TC -> fat blocks amortize per-step overhead.
        return dict(vmem_budget=24 << 20, vmem_cap=64 << 20, two_core=False)
    # v7x (64 MiB VMEM per TC, 2 TCs) or unknown: stay conservative.
    return dict(vmem_budget=8 << 20, vmem_cap=32 << 20, two_core=True)


def _pick_batch_block(N, Lq, Lv, E, *, vmem_budget, two_core):
    """Rows per grid step. Respects the VMEM budget (double-buffered in+out),
    keeps >=2 grid steps on dual-TC parts when there is enough work, and obeys
    the (8,128) block constraint by padding N when the block does not cover it."""
    bytes_per_row = (Lv + Lq) * E * 4 * 2              # fp32, double-buffered
    nb = max(1, min(N, vmem_budget // bytes_per_row))
    if two_core and N >= 16:
        nb = min(nb, pl.cdiv(N, 2))                    # feed both TensorCores
    if nb < N:
        nb = max(8, nb - (nb % 8))                     # 2nd-minor block dim % 8
    num_blocks = pl.cdiv(N, nb)
    n_pad = num_blocks * nb
    return nb, n_pad


def multi_head_attention(values, keys, query, params, *, embed_size, heads, eps=1e-5):
    N, Lq, E = query.shape
    Lv = values.shape[1]
    D = embed_size // heads
    assert E == embed_size and D * heads == embed_size
    del keys  # Keys (and queries) are algebraically dead in this module's forward.

    f32 = jnp.float32
    # Fold per-head (D,D) Wv into block-diag (E,E), fuse with fc_out's Wo^T,
    # then fold the sequence colsum in by tiling the weight Lv times over rows.
    wv_block = jnp.kron(jnp.eye(heads, dtype=f32), params["wv"].T.astype(f32))  # (E,E)
    w_fused = wv_block @ params["wo"].T.astype(f32)                             # (E,E)
    w_big = jnp.tile(w_fused, (Lv, 1))                                          # (Lv*E, E)
    bgb = jnp.stack(
        [params["bo"], params["ln_gamma"], params["ln_beta"]]
    ).astype(f32)                                                               # (3, E)

    v2d = values.reshape(N, Lv * E)                                             # lane-dense

    prof = _device_profile()
    Nb, n_pad = _pick_batch_block(N, Lq, Lv, E,
                                  vmem_budget=prof["vmem_budget"],
                                  two_core=prof["two_core"])
    if n_pad != N:
        v2d = jnp.pad(v2d, ((0, n_pad - N), (0, 0)))
    grid = (n_pad // Nb,)

    # Advisory cost hint for the XLA scheduler.
    flops = n_pad * (2 * (Lv * E) * E + 8 * E)
    bytes_accessed = 4 * (n_pad * Lv * E + n_pad * Lq * E + Lv * E * E + 3 * E)
    cost = pl.CostEstimate(flops=flops, transcendentals=n_pad,
                           bytes_accessed=bytes_accessed)

    # Explicit VMEM ceiling with headroom, capped per device generation.
    per_step = 2 * Nb * (Lv + Lq) * E * 4 + (Lv * E * E + 3 * E) * 4 * 2
    vmem_limit = int(min(max(4 * per_step, 4 << 20), prof["vmem_cap"]))

    kernel = functools.partial(_mha_kernel, eps=eps, lq=Lq)
    fn = pl.pallas_call(
        kernel,
        out_shape=jax.ShapeDtypeStruct((n_pad, Lq * E), query.dtype),
        grid=grid,
        in_specs=[
            pl.BlockSpec((Nb, Lv * E), lambda n: (n, 0)),    # values (lane-dense)
            pl.BlockSpec((Lv * E, E), lambda n: (0, 0)),     # fused/tiled weight
            pl.BlockSpec((3, E), lambda n: (0, 0)),          # bias / gamma / beta
        ],
        out_specs=pl.BlockSpec((Nb, Lq * E), lambda n: (n, 0)),
        compiler_params=pltpu.CompilerParams(
            dimension_semantics=("parallel",),
            vmem_limit_bytes=vmem_limit),
        cost_estimate=cost,
    )
    out2d = fn(v2d, w_big, bgb)
    if n_pad != N:
        out2d = out2d[:N]
    return out2d.reshape(N, Lq, E)   # metadata-only reshape


def _reference(values, keys, query, params, *, embed_size, heads, eps=1e-5):
    """Faithful pure-JAX reproduction of the PyTorch forward (eval mode),
    including the full Q/K/softmax path and the original einsum."""
    N, Lq, E = query.shape
    Lk, Lv = keys.shape[1], values.shape[1]
    D = embed_size // heads
    v = values.reshape(N, Lv, heads, D) @ params["wv"].T
    k = keys.reshape(N, Lk, heads, D) @ params["wk"].T
    q = query.reshape(N, Lq, heads, D) @ params["wq"].T
    energy = jnp.einsum("nqhd,nkhd->nhqk", q, k)
    attn = jax.nn.softmax(energy / (embed_size ** 0.5), axis=3)
    # TODO(synk): nn.Dropout(0.1) treated as identity (eval-mode semantics).
    out = jnp.einsum("nhqk,nvhd->nqhd", attn, v).reshape(N, Lq, embed_size)
    out = out @ params["wo"].T + params["bo"]
    mu = out.mean(-1, keepdims=True)
    var = ((out - mu) ** 2).mean(-1, keepdims=True)
    return (out - mu) * jax.lax.rsqrt(var + eps) * params["ln_gamma"] + params["ln_beta"]


if __name__ == "__main__":
    embed_size, heads = 32, 4
    head_dim = embed_size // heads
    N, L = 2, 8

    key = jax.random.PRNGKey(0)
    k_iter = iter(jax.random.split(key, 10))

    params = {
        "wq": jax.random.normal(next(k_iter), (head_dim, head_dim), jnp.float32) * 0.2,
        "wk": jax.random.normal(next(k_iter), (head_dim, head_dim), jnp.float32) * 0.2,
        "wv": jax.random.normal(next(k_iter), (head_dim, head_dim), jnp.float32) * 0.2,
        "wo": jax.random.normal(next(k_iter), (embed_size, embed_size), jnp.float32) * 0.1,
        "bo": jax.random.normal(next(k_iter), (embed_size,), jnp.float32) * 0.1,
        "ln_gamma": jnp.ones((embed_size,), jnp.float32),
        "ln_beta": jnp.zeros((embed_size,), jnp.float32),
    }

    values = jax.random.normal(next(k_iter), (N, L, embed_size), jnp.float32)
    keys = jax.random.normal(next(k_iter), (N, L, embed_size), jnp.float32)
    query = jax.random.normal(next(k_iter), (N, L, embed_size), jnp.float32)

    out = multi_head_attention(values, keys, query, params,
                               embed_size=embed_size, heads=heads)
    out = jax.block_until_ready(out)

    ref = _reference(values, keys, query, params, embed_size=embed_size, heads=heads)
    assert out.shape == (N, L, embed_size)
    assert jnp.allclose(out, ref, atol=1e-4, rtol=1e-4), "mismatch vs reference"

    print("KERNEL_OK")
</pallas_src>

<mosaic_0001>
module attributes {stable_mosaic.version = 11 : i64} {
  func.func @_mha_kernel(%arg0: i32, %arg1: memref<2x256xf32, #tpu.memory_space<vmem>>, %arg2: memref<256x32xf32, #tpu.memory_space<vmem>>, %arg3: memref<3x32xf32, #tpu.memory_space<vmem>>, %arg4: memref<2x256xf32, #tpu.memory_space<vmem>>) attributes {dimension_semantics = [#tpu.dimension_semantics<parallel>], iteration_bounds = array<i64: 1>, scalar_prefetch = 0 : i64, scratch_operands = 0 : i64, tpu.core_type = #tpu.core_type<tc>, window_params = [{transform_indices = @transform_0, window_bounds = array<i64: 2, 256>}, {pipeline_mode = #tpu.pipeline_mode<synchronous>, transform_indices = @transform_1, window_bounds = array<i64: 256, 32>}, {pipeline_mode = #tpu.pipeline_mode<synchronous>, transform_indices = @transform_2, window_bounds = array<i64: 3, 32>}, {transform_indices = @transform_3, window_bounds = array<i64: 2, 256>}]} {
    %c0 = arith.constant 0 : index
    %c0_0 = arith.constant 0 : index
    %0 = vector.load %arg1[%c0, %c0_0] : memref<2x256xf32, #tpu.memory_space<vmem>>, vector<2x256xf32>
    %c0_1 = arith.constant 0 : index
    %c0_2 = arith.constant 0 : index
    %1 = vector.load %arg2[%c0_1, %c0_2] : memref<256x32xf32, #tpu.memory_space<vmem>>, vector<256x32xf32>
    %cst = arith.constant dense<0.000000e+00> : vector<2x32xf32>
    %2 = tpu.matmul %0, %1, %cst {dimension_numbers = #tpu.dot_dimension_numbers<[1], [0], [0], [1], [0, 0, 1, 1], [], []>} : vector<2x256xf32>, vector<256x32xf32>, vector<2x32xf32> -> vector<2x32xf32>
    %c0_3 = arith.constant 0 : index
    %c0_4 = arith.constant 0 : index
    %3 = vector.load %arg3[%c0_3, %c0_4] : memref<3x32xf32, #tpu.memory_space<vmem>>, vector<1x32xf32>
    %4 = vector.broadcast %3 : vector<1x32xf32> to vector<2x32xf32>
    %5 = arith.addf %2, %4 : vector<2x32xf32>
    %cst_5 = arith.constant dense<0.000000e+00> : vector<2xf32>
    %6 = vector.multi_reduction <add>, %5, %cst_5 [1] : vector<2x32xf32> to vector<2xf32>
    %7 = vector.shape_cast %6 : vector<2xf32> to vector<2x1xf32>
    %cst_6 = arith.constant 3.200000e+01 : f32
    %8 = vector.broadcast %cst_6 : f32 to vector<2x1xf32>
    %9 = arith.divf %7, %8 : vector<2x1xf32>
    %10 = arith.mulf %5, %5 : vector<2x32xf32>
    %cst_7 = arith.constant dense<0.000000e+00> : vector<2xf32>
    %11 = vector.multi_reduction <add>, %10, %cst_7 [1] : vector<2x32xf32> to vector<2xf32>
    %12 = vector.shape_cast %11 : vector<2xf32> to vector<2x1xf32>
    %cst_8 = arith.constant 3.200000e+01 : f32
    %13 = vector.broadcast %cst_8 : f32 to vector<2x1xf32>
    %14 = arith.divf %12, %13 : vector<2x1xf32>
    %15 = arith.mulf %9, %9 : vector<2x1xf32>
    %16 = arith.subf %14, %15 : vector<2x1xf32>
    %cst_9 = arith.constant 9.99999974E-6 : f32
    %17 = vector.broadcast %cst_9 : f32 to vector<2x1xf32>
    %18 = arith.addf %16, %17 : vector<2x1xf32>
    %19 = math.rsqrt %18 : vector<2x1xf32>
    %20 = vector.broadcast %9 : vector<2x1xf32> to vector<2x32xf32>
    %21 = arith.subf %5, %20 : vector<2x32xf32>
    %22 = vector.broadcast %19 : vector<2x1xf32> to vector<2x32xf32>
    %23 = arith.mulf %21, %22 : vector<2x32xf32>
    %c1 = arith.constant 1 : index
    %c0_10 = arith.constant 0 : index
    %24 = vector.load %arg3[%c1, %c0_10] : memref<3x32xf32, #tpu.memory_space<vmem>>, vector<1x32xf32>
    %25 = vector.broadcast %24 : vector<1x32xf32> to vector<2x32xf32>
    %26 = arith.mulf %23, %25 : vector<2x32xf32>
    %c2 = arith.constant 2 : index
    %c0_11 = arith.constant 0 : index
    %27 = vector.load %arg3[%c2, %c0_11] : memref<3x32xf32, #tpu.memory_space<vmem>>, vector<1x32xf32>
    %28 = vector.broadcast %27 : vector<1x32xf32> to vector<2x32xf32>
    %29 = arith.addf %26, %28 : vector<2x32xf32>
    %30 = tpu.concatenate %29, %29, %29, %29, %29, %29, %29, %29 in 1 : vector<2x32xf32>, vector<2x32xf32>, vector<2x32xf32>, vector<2x32xf32>, vector<2x32xf32>, vector<2x32xf32>, vector<2x32xf32>, vector<2x32xf32> -> vector<2x256xf32>
    %c0_12 = arith.constant 0 : index
    %c0_13 = arith.constant 0 : index
    %31 = vector.load %arg4[%c0_12, %c0_13] : memref<2x256xf32, #tpu.memory_space<vmem>>, vector<2x256xf32>
    tpu.vector_store %arg4[%c0_12, %c0_13], %30 {strides = array<i32>} : memref<2x256xf32, #tpu.memory_space<vmem>>, vector<2x256xf32>,
    return
  }
  func.func @transform_0(%arg0: i32) -> (i32, i32) {
    %c0_i32 = arith.constant 0 : i32
    %c0_i32_0 = arith.constant 0 : i32
    return %arg0, %c0_i32 : i32, i32
  }
  func.func @transform_1(%arg0: i32) -> (i32, i32) {
    %c0_i32 = arith.constant 0 : i32
    %c0_i32_0 = arith.constant 0 : i32
    %c0_i32_1 = arith.constant 0 : i32
    return %c0_i32, %c0_i32_0 : i32, i32
  }
  func.func @transform_2(%arg0: i32) -> (i32, i32) {
    %c0_i32 = arith.constant 0 : i32
    %c0_i32_0 = arith.constant 0 : i32
    %c0_i32_1 = arith.constant 0 : i32
    return %c0_i32, %c0_i32_0 : i32, i32
  }
  func.func @transform_3(%arg0: i32) -> (i32, i32) {
    %c0_i32 = arith.constant 0 : i32
    %c0_i32_0 = arith.constant 0 : i32
    return %arg0, %c0_i32 : i32, i32
  }
}

</mosaic_0001>

<bundles_post_ra>
// kernel: tpu_custom_call.1
= control target key start
LH: loop header
LB: loop body
LE: loop exit
PB: predicated region body
PF: predicated region fallthrough
CT: control target
= control target key end

     0   :  { %s450_s0 = inlined_call_operand.vmem [shape: f32[2,256], index: 0, kind: input, shape index: {}]   ;;  %s451_s1 = inlined_call_operand.vmem [shape: f32[256,32], index: 1, kind: input, shape index: {}]   ;;  %s452_s2 = inlined_call_operand.vmem [shape: f32[3,32], index: 2, kind: input, shape index: {}]   ;;  %s453_s3 = inlined_call_operand.hbm [shape: f32[2,256], index: 3, kind: output, shape index: {}]  }
   0x1   :  { %v32_v0 = vld [vmem:[%s451_s1 + $0x80] sm:$0xff]  ;;  %v33_v1 = vld [vmem:[%s451_s1 + $0x88] sm:$0xff]  ;;  %v34_v5 = vld [vmem:[%s451_s1 + $0x90] sm:$0xff] }
   0x2   :  { %v16_v2 = vld [vmem:[%s451_s1] sm:$0xff]  ;;  %v244_v3 = vpack.c.bf16 %v33_v1, %v32_v0  ;;  %v17_v4 = vld [vmem:[%s451_s1 + $0x8] sm:$0xff]  ;;  %v35_v6 = vld [vmem:[%s451_s1 + $0x98] sm:$0xff] }
   0x3   :  { %v246_v7 = vpack.c.bf16 %v17_v4, %v16_v2  ;;  %v248_v8 = vpack.c.bf16 %v35_v6, %v34_v5  ;;  %v18_v9 = vld [vmem:[%s451_s1 + $0x10] sm:$0xff]  ;;  %v19_v10 = vld [vmem:[%s451_s1 + $0x18] sm:$0xff]  ;;  %v36_v11 = vld [vmem:[%s451_s1 + $0xa0] sm:$0xff] }
   0x4   :  { %245 = vmatprep.subr.bf16.mxu0 %v244_v3  ;;  %v37_v12 = vld [vmem:[%s451_s1 + $0xa8] sm:$0xff]  ;;  %v250_v13 = vpack.c.bf16 %v19_v10, %v18_v9  ;;  %v20_v15 = vld [vmem:[%s451_s1 + $0x20] sm:$0xff]  ;;  %v38_v17 = vld [vmem:[%s451_s1 + $0xb0] sm:$0xff] }
   0x5   :  { %247 = vmatpush3.bf16.msra.mxu0 %v246_v7  ;;  %v252_v14 = vpack.c.bf16 %v37_v12, %v36_v11  ;;  %v21_v16 = vld [vmem:[%s451_s1 + $0x28] sm:$0xff]  ;;  %v39_v18 = vld [vmem:[%s451_s1 + $0xb8] sm:$0xff]  ;;  %v22_v21 = vld [vmem:[%s451_s1 + $0x30] sm:$0xff] }
   0x6   :  { %249 = vmatprep.subr.bf16.mxu0 %v248_v8  ;;  %v254_v19 = vpack.c.bf16 %v21_v16, %v20_v15  ;;  %v256_v20 = vpack.c.bf16 %v39_v18, %v38_v17  ;;  %v23_v22 = vld [vmem:[%s451_s1 + $0x38] sm:$0xff]  ;;  %v40_v23 = vld [vmem:[%s451_s1 + $0xc0] sm:$0xff]  ;;  %v41_v24 = vld [vmem:[%s451_s1 + $0xc8] sm:$0xff] }
   0x7   :  { %v205_v25 = vld.sshfl [vmem:[%s450_s0] sm:$0x33 pattern:$0x76325410] }
   0x8   :  { %v61_v26 = vcombine.high %v205_v25, %v205_v25 }
   0x9   :  { %251 = vmatpush3.bf16.msra.mxu0 %v250_v13 }
   0xa   :  { %253 = vmatprep.subr.bf16.mxu0 %v252_v14 }
   0xb   :  { %8 = vsyncpa [#allocation3], 0  ;;  %v258_v27 = vpack.c.bf16 %v23_v22, %v22_v21  ;;  %v260_v28 = vpack.c.bf16 %v41_v24, %v40_v23  ;;  %v24_v29 = vld [vmem:[%s451_s1 + $0x40] sm:$0xff]  ;;  %v25_v30 = vld [vmem:[%s451_s1 + $0x48] sm:$0xff]  ;;  %128 = vmatprep.mubr.f32.mxu0 %v61_v26  ;;  %vm134_vm0 = vcmask 254976   ;;  %s306_s28 = smov 96  }
   0xc   :  { %v42_v31 = vld [vmem:[%s451_s1 + $0xd0] sm:$0xff]  ;;  %v43_v32 = vld [vmem:[%s451_s1 + $0xd8] sm:$0xff]  ;;  %v262_v33 = vpack.c.bf16 %v25_v30, %v24_v29  ;;  %v44_v37 = vld [vmem:[%s451_s1 + $0xe0] sm:$0xff]  ;;  %s307_s0 = smov 32   ;;  %s308_s29 = smov 64   ;;  %vm173_vm1 = vcmask 261120  }
   0xd   :  { %255 = vmatpush3.bf16.msra.mxu0 %v254_v19  ;;  %v264_v34 = vpack.c.bf16 %v43_v32, %v42_v31  ;;  %v26_v35 = vld [vmem:[%s451_s1 + $0x50] sm:$0xff]  ;;  %v27_v36 = vld [vmem:[%s451_s1 + $0x58] sm:$0xff]  ;;  %v45_v38 = vld [vmem:[%s451_s1 + $0xe8] sm:$0xff]  ;;  %vm175_vm2 = vcmask 523264   ;;  %vm177_vm3 = vcmask 785408   ;;  %s309_s30 = smov [#allocation2]  }
   0xe   :  { %257 = vmatprep.subr.bf16.mxu0 %v256_v20  ;;  %v266_v39 = vpack.c.bf16 %v27_v36, %v26_v35  ;;  %v268_v40 = vpack.c.bf16 %v45_v38, %v44_v37  ;;  %v28_v41 = vld [vmem:[%s451_s1 + $0x60] sm:$0xff]  ;;  %v29_v42 = vld [vmem:[%s451_s1 + $0x68] sm:$0xff]  ;;  %v46_v43 = vld [vmem:[%s451_s1 + $0xf0] sm:$0xff]  ;;  %s196_s4 = sshll.u32 %s309_s30, 4  ;;  %s197_s4 = int_to_ptr.vmem [resolvable:$true] %s196_s4 }
   0xf   :  { %v47_v44 = vld [vmem:[%s451_s1 + $0xf8] sm:$0xff]  ;;  %v270_v45 = vpack.c.bf16 %v29_v42, %v28_v41  ;;  %v30_v47 = vld [vmem:[%s451_s1 + $0x70] sm:$0xff]  ;;  %v204_v51 = vld [vmem:[%s452_s2] ss:$0 sm:$0xff]  ;;  %p287_p1 = scmp.lt.s32.totalorder %s197_s4, %s197_s4 }
  0x10   :  { %v272_v46 = vpack.c.bf16 %v47_v44, %v46_v43  ;;  %v31_v48 = vld [vmem:[%s451_s1 + $0x78] sm:$0xff]  ;;  %v206_v3 = vld [vmem:[%s452_s2 + $0x1] ss:$0 sm:$0xff]  ;;  %v207_v5 = vld [vmem:[%s452_s2 + $0x2] ss:$0 sm:$0xff]  ;;  %s282_s2 = scalar_lea.vmem %s197_s4, 64 }
  0x11   :  { %259 = vmatpush3.bf16.msra.mxu0 %v258_v27  ;;  %v274_v49 = vpack.c.bf16 %v31_v48, %v30_v47  ;;  %p283_p0 = scmp.ne.s32.totalorder %s197_s4, %s282_s2  ;;  %p288_p2 = scmp.lt.s32.totalorder %s282_s2, %s282_s2 }
  0x12   :  { %261 = vmatprep.subr.bf16.mxu0 %v260_v28 }
  0x13   :  { %p289_p3 = por %p288_p2, %p287_p1 }
  0x15   :  { %263 = vmatpush3.bf16.msra.mxu0 %v262_v33  ;;  %p290_p4 = pnand %p289_p3, %p283_p0 }
  0x16   :  { %265 = vmatprep.subr.bf16.mxu0 %v264_v34 }
  0x19   :  { %267 = vmatpush3.bf16.msra.mxu0 %v266_v39 }
  0x1a   :  { %269 = vmatprep.subr.bf16.mxu0 %v268_v40 }
  0x1d   :  { %271 = vmatpush3.bf16.msra.mxu0 %v270_v45 }
  0x1e   :  { %273 = vmatprep.subr.bf16.mxu0 %v272_v46 }
  0x21   :  { %275 = vmatpush3.bf16.msra.mxu0 %v274_v49 }
  0x24   :  { %129 = vmatmul.mubr.f32.vlgmr.msra.gmra.mrb[0].mxu0 %v205_v25 }
  0xf7   :  { %v241_v50 = vpop.f32.mrb[0].mxu0 }
  0xf8   :  { %v242_v52 = vpop.f32.mrb[1].mxu0 }
  0xf9   :  { %v243_v53 = vadd.f32 %v242_v52, %v241_v50 }
  0xfb   :  { %v131_v54 = vadd.f32 %v243_v53, %v204_v51 }
  0xfd   :  { %v135_v55 = vsel %vm134_vm0, %v131_v54, 0.0  ;;  %v140_v56 = vmul.f32 %v131_v54, %v131_v54 }
  0xfe   :  { %136 = vadd.xlane.f32.xlu0 %v135_v55 }
  0xff   :  { %v141_v57 = vsel %vm134_vm0, %v140_v56, 0.0 }
 0x102   :  { %142 = vadd.xlane.f32.xlu0 %v141_v57 }
 0x18b   :  { %v137_v58 = vpop.xlane.xlu0 %136 }
 0x18c   :  { %v139_v59 = vmul.f32 0.03125, %v137_v58 }
 0x18e   :  { %v145_v61 = vmul.f32 %v139_v59, %v139_v59  ;;  %v149_v1 = vsub.f32 %v131_v54, %v139_v59 }
 0x18f   :  { %v143_v60 = vpop.xlane.xlu0 %142 }
 0x190   :  { %v144_v62 = vmul.f32 0.03125, %v143_v60 }
 0x192   :  { %v146_v63 = vsub.f32 %v144_v62, %v145_v61 }
 0x194   :  { %v147_v0 = vadd.f32 1e-05, %v146_v63 }
 0x196   :  { %280 = vrsqrt.f32 %v147_v0 }
 0x1a0   :  { %v281_v2 = vpop.eup %280 }
 0x1a1   :  { %v150_v4 = vmul.f32 %v281_v2, %v149_v1 }
 0x1a3   :  { %v156_v6 = vmul.f32 %v206_v3, %v150_v4 }
 0x1a5   :  { %v162_v7 = vadd.f32 %v207_v5, %v156_v6 }
 0x1a7   :  { %170 = vrot.lane.b32.xlu0 %v162_v7, %s306_s28  ;;  %164 = vrot.lane.b32.xlu1 %v162_v7, %s307_s0 }
 0x1ab   :  { %167 = vrot.lane.b32.xlu1 %v162_v7, %s308_s29 }
 0x219   :  { %v165_v8 = vpop.permute.xlu1 %164  ;;  %v171_v11 = vpop.permute.xlu0 %170 }
 0x21a   :  { %v174_v9 = vsel %vm173_vm1, %v162_v7, %v165_v8 }
 0x21d   :  { %v168_v10 = vpop.permute.xlu1 %167 }
 0x21e   :  { %v176_v12 = vsel %vm175_vm2, %v174_v9, %v168_v10 }
 0x21f   :  { %v178_v13 = vsel %vm177_vm3, %v176_v12, %v171_v11 }
 0x220   :  { %v180_v14 = vcombine.low %v178_v13, %v178_v13 }
 0x222   :  { %208 = vst.sshfl [vmem:[#allocation2] sm:$0x33 pattern:$0x76325410] %v180_v14 }
 0x223   :  { %293 = shalt.err (!%p290_p4)
}
 0x224   :  { %s294_s7 = scalar_lea.hbm %s453_s3, 64 }
 0x225   :  { %p295_p5 = scmp.ne.s32.totalorder %s453_s3, %s294_s7  ;;  %p298_p6 = scmp.lt.u32.totalorder %s294_s7, %s453_s3 }
 0x227   :  { %p300_p7 = pnand %p298_p6, %p295_p5 }
 0x229   :  { %303 = shalt.err (!%p300_p7)
}
 0x22a   :  { %199 = dma.vmem_to_hbm [thread:$0]  %s197_s4, 64, %s453_s3, [#allocation3]  }
 0x22b   :  { %304 = dma.done.wait [#allocation3], 64  }
 0x22c   :  { %305 = vsyncadd [#allocation3], 4294967232 }
 0x22d   :  { %203 = vsyncpa [#allocation3], 1 }

</bundles_post_ra>
